<compile_context>
chip_gen: v6e
topology: v6e:2x2x1
jax: 0.10.0
libtpu: 0.0.40
codegen_flags: <defaults>
</compile_context>

<pallas_src>
import jax
import jax.numpy as jnp
from jax.experimental import pallas as pl
from jax.experimental.pallas import tpu as pltpu


def qnet_kernel(sa_ref,
                wsa_ref, bsa_ref,
                w1_ref, b1_ref,
                w2_ref, b2_ref,
                wo_ref, bo_ref,
                out_ref):
    # fused fc_s / fc_a: h = relu([state|action] @ blkdiag(Ws, Wa) + [bs|ba])
    #   (TB, 4) @ (4, 128) -> (TB, 128)
    h = jnp.maximum(
        jnp.dot(sa_ref[...], wsa_ref[...], preferred_element_type=jnp.float32)
        + bsa_ref[...], 0.0)
    # fc1 + relu                       (TB, 128)
    q = jnp.maximum(
        jnp.dot(h, w1_ref[...], preferred_element_type=jnp.float32)
        + b1_ref[...], 0.0)
    # fc2 + relu                       (TB, 64)
    q = jnp.maximum(
        jnp.dot(q, w2_ref[...], preferred_element_type=jnp.float32)
        + b2_ref[...], 0.0)
    # out head: (TB, 64) x (1, 64) -> lane reduction on VPU/XLU, no MXU push
    out_ref[...] = (
        jnp.sum(q * wo_ref[...], axis=-1, keepdims=True)
        + bo_ref[...]).astype(out_ref.dtype)


def pack_params(params):
    """Fold the raw per-layer params into the kernel's fused layout."""
    (ws, bs, wa, ba, w1, b1, w2, b2, wo, bo) = params
    # block-diagonal first layer: rows 0..2 -> state path, row 3 -> action path
    w_sa = jnp.zeros((4, 128), jnp.float32)
    w_sa = w_sa.at[:3, :64].set(ws)       # (3, 64)
    w_sa = w_sa.at[3:, 64:].set(wa)       # (1, 64)
    b_sa = jnp.concatenate([bs, ba], axis=-1)   # (1, 128)
    wo_row = wo.reshape(1, 64)            # head as a broadcast row
    return (w_sa, b_sa, w1, b1, w2, b2, wo_row, bo)


def qnetwork_forward(state, action, params, *, tb=128):
    """state: (B, 3) f32, action: (B, 1) f32 -> (B, 1) f32."""
    B = state.shape[0]
    (w_sa, b_sa, w1, b1, w2, b2, wo_row, bo) = pack_params(params)

    # single fused activation input; pad batch up to a multiple of the tile
    sa = jnp.concatenate([state, action], axis=-1).astype(jnp.float32)  # (B, 4)
    n_tiles = pl.cdiv(B, tb)
    bp = n_tiles * tb
    if bp != B:
        sa = jnp.pad(sa, ((0, bp - B), (0, 0)))

    def const(shape):
        # weights/biases: one block, fetched once, VMEM-resident across steps
        return pl.BlockSpec(shape, lambda i: (0, 0))

    out = pl.pallas_call(
        qnet_kernel,
        out_shape=jax.ShapeDtypeStruct((bp, 1), jnp.float32),
        grid=(n_tiles,),
        in_specs=[
            pl.BlockSpec((tb, 4), lambda i: (i, 0)),     # fused state|action
            const(w_sa.shape), const(b_sa.shape),
            const(w1.shape), const(b1.shape),
            const(w2.shape), const(b2.shape),
            const(wo_row.shape), const(bo.shape),
        ],
        out_specs=pl.BlockSpec((tb, 1), lambda i: (i, 0)),
        compiler_params=pltpu.CompilerParams(
            dimension_semantics=("parallel",)),
    )(sa, w_sa, b_sa, w1, b1, w2, b2, wo_row, bo)

    return out[:B]


def init_params(key):
    """Deterministic PyTorch-style (uniform +-1/sqrt(fan_in)) init.

    Weights are returned already transposed to (in, out)."""
    def linear(key, fan_in, fan_out):
        kw, kb = jax.random.split(key)
        bound = 1.0 / jnp.sqrt(jnp.float32(fan_in))
        w = jax.random.uniform(kw, (fan_in, fan_out), jnp.float32, -bound, bound)
        b = jax.random.uniform(kb, (1, fan_out), jnp.float32, -bound, bound)
        return w, b

    keys = jax.random.split(key, 5)
    ws, bs = linear(keys[0], 3, 64)     # fc_s
    wa, ba = linear(keys[1], 1, 64)     # fc_a
    w1, b1 = linear(keys[2], 128, 128)  # fc1
    w2, b2 = linear(keys[3], 128, 64)   # fc2
    wo, bo = linear(keys[4], 64, 1)     # out
    return (ws, bs, wa, ba, w1, b1, w2, b2, wo, bo)


def reference_forward(state, action, params):
    (ws, bs, wa, ba, w1, b1, w2, b2, wo, bo) = params
    h1 = jax.nn.relu(state @ ws + bs)
    h2 = jax.nn.relu(action @ wa + ba)
    h = jnp.concatenate([h1, h2], axis=-1)
    q = jax.nn.relu(h @ w1 + b1)
    q = jax.nn.relu(q @ w2 + b2)
    return q @ wo + bo


if __name__ == "__main__":
    key = jax.random.PRNGKey(0)
    kp, ks, ka = jax.random.split(key, 3)
    params = init_params(kp)

    # B deliberately NOT a multiple of the tile size, and > 1 tile, to
    # exercise both the batch grid and the ragged-tail padding path.
    B = 200
    state = jax.random.normal(ks, (B, 3), jnp.float32)
    action = jax.random.normal(ka, (B, 1), jnp.float32)

    out = qnetwork_forward(state, action, params, tb=128)
    out = jax.block_until_ready(out)

    ref = reference_forward(state, action, params)
    assert out.shape == (B, 1)
    assert jnp.allclose(out, ref, atol=1e-4, rtol=1e-4), "mismatch vs JAX reference"

    print("KERNEL_OK")
</pallas_src>

<mosaic_0001>
module attributes {stable_mosaic.version = 11 : i64} {
  func.func @qnet_kernel(%arg0: i32, %arg1: memref<128x4xf32, #tpu.memory_space<vmem>>, %arg2: memref<4x128xf32, #tpu.memory_space<vmem>>, %arg3: memref<1x128xf32, #tpu.memory_space<vmem>>, %arg4: memref<128x128xf32, #tpu.memory_space<vmem>>, %arg5: memref<1x128xf32, #tpu.memory_space<vmem>>, %arg6: memref<128x64xf32, #tpu.memory_space<vmem>>, %arg7: memref<1x64xf32, #tpu.memory_space<vmem>>, %arg8: memref<1x64xf32, #tpu.memory_space<vmem>>, %arg9: memref<1x1xf32, #tpu.memory_space<vmem>>, %arg10: memref<128x1xf32, #tpu.memory_space<vmem>>) attributes {dimension_semantics = [#tpu.dimension_semantics<parallel>], iteration_bounds = array<i64: 2>, scalar_prefetch = 0 : i64, scratch_operands = 0 : i64, tpu.core_type = #tpu.core_type<tc>, window_params = [{transform_indices = @transform_0, window_bounds = array<i64: 128, 4>}, {pipeline_mode = #tpu.pipeline_mode<synchronous>, transform_indices = @transform_1, window_bounds = array<i64: 4, 128>}, {pipeline_mode = #tpu.pipeline_mode<synchronous>, transform_indices = @transform_2, window_bounds = array<i64: 1, 128>}, {pipeline_mode = #tpu.pipeline_mode<synchronous>, transform_indices = @transform_3, window_bounds = array<i64: 128, 128>}, {pipeline_mode = #tpu.pipeline_mode<synchronous>, transform_indices = @transform_4, window_bounds = array<i64: 1, 128>}, {pipeline_mode = #tpu.pipeline_mode<synchronous>, transform_indices = @transform_5, window_bounds = array<i64: 128, 64>}, {pipeline_mode = #tpu.pipeline_mode<synchronous>, transform_indices = @transform_6, window_bounds = array<i64: 1, 64>}, {pipeline_mode = #tpu.pipeline_mode<synchronous>, transform_indices = @transform_7, window_bounds = array<i64: 1, 64>}, {pipeline_mode = #tpu.pipeline_mode<synchronous>, transform_indices = @transform_8, window_bounds = array<i64: 1, 1>}, {transform_indices = @transform_9, window_bounds = array<i64: 128, 1>}]} {
    %c0 = arith.constant 0 : index
    %c0_0 = arith.constant 0 : index
    %0 = vector.load %arg1[%c0, %c0_0] : memref<128x4xf32, #tpu.memory_space<vmem>>, vector<128x4xf32>
    %c0_1 = arith.constant 0 : index
    %c0_2 = arith.constant 0 : index
    %1 = vector.load %arg2[%c0_1, %c0_2] : memref<4x128xf32, #tpu.memory_space<vmem>>, vector<4x128xf32>
    %cst = arith.constant dense<0.000000e+00> : vector<128x128xf32>
    %2 = tpu.matmul %0, %1, %cst {dimension_numbers = #tpu.dot_dimension_numbers<[1], [0], [0], [1], [0, 0, 1, 1], [], []>} : vector<128x4xf32>, vector<4x128xf32>, vector<128x128xf32> -> vector<128x128xf32>
    %c0_3 = arith.constant 0 : index
    %c0_4 = arith.constant 0 : index
    %3 = vector.load %arg3[%c0_3, %c0_4] : memref<1x128xf32, #tpu.memory_space<vmem>>, vector<1x128xf32>
    %4 = vector.broadcast %3 : vector<1x128xf32> to vector<128x128xf32>
    %5 = arith.addf %2, %4 : vector<128x128xf32>
    %cst_5 = arith.constant 0.000000e+00 : f32
    %6 = vector.broadcast %cst_5 : f32 to vector<128x128xf32>
    %7 = arith.maximumf %5, %6 : vector<128x128xf32>
    %c0_6 = arith.constant 0 : index
    %c0_7 = arith.constant 0 : index
    %8 = vector.load %arg4[%c0_6, %c0_7] : memref<128x128xf32, #tpu.memory_space<vmem>>, vector<128x128xf32>
    %cst_8 = arith.constant dense<0.000000e+00> : vector<128x128xf32>
    %9 = tpu.matmul %7, %8, %cst_8 {dimension_numbers = #tpu.dot_dimension_numbers<[1], [0], [0], [1], [0, 0, 1, 1], [], []>} : vector<128x128xf32>, vector<128x128xf32>, vector<128x128xf32> -> vector<128x128xf32>
    %c0_9 = arith.constant 0 : index
    %c0_10 = arith.constant 0 : index
    %10 = vector.load %arg5[%c0_9, %c0_10] : memref<1x128xf32, #tpu.memory_space<vmem>>, vector<1x128xf32>
    %11 = vector.broadcast %10 : vector<1x128xf32> to vector<128x128xf32>
    %12 = arith.addf %9, %11 : vector<128x128xf32>
    %cst_11 = arith.constant 0.000000e+00 : f32
    %13 = vector.broadcast %cst_11 : f32 to vector<128x128xf32>
    %14 = arith.maximumf %12, %13 : vector<128x128xf32>
    %c0_12 = arith.constant 0 : index
    %c0_13 = arith.constant 0 : index
    %15 = vector.load %arg6[%c0_12, %c0_13] : memref<128x64xf32, #tpu.memory_space<vmem>>, vector<128x64xf32>
    %cst_14 = arith.constant dense<0.000000e+00> : vector<128x64xf32>
    %16 = tpu.matmul %14, %15, %cst_14 {dimension_numbers = #tpu.dot_dimension_numbers<[1], [0], [0], [1], [0, 0, 1, 1], [], []>} : vector<128x128xf32>, vector<128x64xf32>, vector<128x64xf32> -> vector<128x64xf32>
    %c0_15 = arith.constant 0 : index
    %c0_16 = arith.constant 0 : index
    %17 = vector.load %arg7[%c0_15, %c0_16] : memref<1x64xf32, #tpu.memory_space<vmem>>, vector<1x64xf32>
    %18 = vector.broadcast %17 : vector<1x64xf32> to vector<128x64xf32>
    %19 = arith.addf %16, %18 : vector<128x64xf32>
    %cst_17 = arith.constant 0.000000e+00 : f32
    %20 = vector.broadcast %cst_17 : f32 to vector<128x64xf32>
    %21 = arith.maximumf %19, %20 : vector<128x64xf32>
    %c0_18 = arith.constant 0 : index
    %c0_19 = arith.constant 0 : index
    %22 = vector.load %arg8[%c0_18, %c0_19] : memref<1x64xf32, #tpu.memory_space<vmem>>, vector<1x64xf32>
    %23 = vector.broadcast %22 : vector<1x64xf32> to vector<128x64xf32>
    %24 = arith.mulf %21, %23 : vector<128x64xf32>
    %cst_20 = arith.constant dense<0.000000e+00> : vector<128xf32>
    %25 = vector.multi_reduction <add>, %24, %cst_20 [1] : vector<128x64xf32> to vector<128xf32>
    %26 = vector.shape_cast %25 : vector<128xf32> to vector<128x1xf32>
    %c0_21 = arith.constant 0 : index
    %c0_22 = arith.constant 0 : index
    %27 = vector.load %arg9[%c0_21, %c0_22] : memref<1x1xf32, #tpu.memory_space<vmem>>, vector<1x1xf32>
    %28 = vector.broadcast %27 : vector<1x1xf32> to vector<128x1xf32>
    %29 = arith.addf %26, %28 : vector<128x1xf32>
    %c0_23 = arith.constant 0 : index
    %c0_24 = arith.constant 0 : index
    %30 = vector.load %arg10[%c0_23, %c0_24] : memref<128x1xf32, #tpu.memory_space<vmem>>, vector<128x1xf32>
    tpu.vector_store %arg10[%c0_23, %c0_24], %29 {strides = array<i32>} : memref<128x1xf32, #tpu.memory_space<vmem>>, vector<128x1xf32>,
    return
  }
  func.func @transform_0(%arg0: i32) -> (i32, i32) {
    %c0_i32 = arith.constant 0 : i32
    %c0_i32_0 = arith.constant 0 : i32
    return %arg0, %c0_i32 : i32, i32
  }
  func.func @transform_1(%arg0: i32) -> (i32, i32) {
    %c0_i32 = arith.constant 0 : i32
    %c0_i32_0 = arith.constant 0 : i32
    %c0_i32_1 = arith.constant 0 : i32
    return %c0_i32, %c0_i32_0 : i32, i32
  }
  func.func @transform_2(%arg0: i32) -> (i32, i32) {
    %c0_i32 = arith.constant 0 : i32
    %c0_i32_0 = arith.constant 0 : i32
    %c0_i32_1 = arith.constant 0 : i32
    return %c0_i32, %c0_i32_0 : i32, i32
  }
  func.func @transform_3(%arg0: i32) -> (i32, i32) {
    %c0_i32 = arith.constant 0 : i32
    %c0_i32_0 = arith.constant 0 : i32
    %c0_i32_1 = arith.constant 0 : i32
    return %c0_i32, %c0_i32_0 : i32, i32
  }
  func.func @transform_4(%arg0: i32) -> (i32, i32) {
    %c0_i32 = arith.constant 0 : i32
    %c0_i32_0 = arith.constant 0 : i32
    %c0_i32_1 = arith.constant 0 : i32
    return %c0_i32, %c0_i32_0 : i32, i32
  }
  func.func @transform_5(%arg0: i32) -> (i32, i32) {
    %c0_i32 = arith.constant 0 : i32
    %c0_i32_0 = arith.constant 0 : i32
    %c0_i32_1 = arith.constant 0 : i32
    return %c0_i32, %c0_i32_0 : i32, i32
  }
  func.func @transform_6(%arg0: i32) -> (i32, i32) {
    %c0_i32 = arith.constant 0 : i32
    %c0_i32_0 = arith.constant 0 : i32
    %c0_i32_1 = arith.constant 0 : i32
    return %c0_i32, %c0_i32_0 : i32, i32
  }
  func.func @transform_7(%arg0: i32) -> (i32, i32) {
    %c0_i32 = arith.constant 0 : i32
    %c0_i32_0 = arith.constant 0 : i32
    %c0_i32_1 = arith.constant 0 : i32
    return %c0_i32, %c0_i32_0 : i32, i32
  }
  func.func @transform_8(%arg0: i32) -> (i32, i32) {
    %c0_i32 = arith.constant 0 : i32
    %c0_i32_0 = arith.constant 0 : i32
    %c0_i32_1 = arith.constant 0 : i32
    return %c0_i32, %c0_i32_0 : i32, i32
  }
  func.func @transform_9(%arg0: i32) -> (i32, i32) {
    %c0_i32 = arith.constant 0 : i32
    %c0_i32_0 = arith.constant 0 : i32
    return %arg0, %c0_i32 : i32, i32
  }
}

</mosaic_0001>

<bundles_post_ra>
// kernel: tpu_custom_call.1
= control target key start
LH: loop header
LB: loop body
LE: loop exit
PB: predicated region body
PF: predicated region fallthrough
CT: control target
= control target key end

     0   :  { %s1433_s11 = smov 0   ;;  %s1688_s0 = inlined_call_operand.vmem [shape: f32[256,4], index: 0, kind: input, shape index: {}]   ;;  %s1689_s1 = inlined_call_operand.vmem [shape: f32[4,128], index: 1, kind: input, shape index: {}]   ;;  %s1690_s2 = inlined_call_operand.vmem [shape: f32[1,128], index: 2, kind: input, shape index: {}]   ;;  %s1691_s3 = inlined_call_operand.vmem [shape: f32[128,128], index: 3, kind: input, shape index: {}]   ;;  %s1692_s4 = inlined_call_operand.vmem [shape: f32[1,128], index: 4, kind: input, shape index: {}]   ;;  %s1693_s5 = inlined_call_operand.vmem [shape: f32[128,64], index: 5, kind: input, shape index: {}]   ;;  %s1694_s6 = inlined_call_operand.vmem [shape: f32[1,64], index: 6, kind: input, shape index: {}]   ;;  %s1695_s7 = inlined_call_operand.vmem [shape: f32[1,64], index: 7, kind: input, shape index: {}]   ;;  %s1696_s8 = inlined_call_operand.<no memory space> [shape: f32[1,1], index: 8, kind: input, shape index: {}]   ;;  %s1697_s9 = inlined_call_operand.vmem [shape: f32[256,1], index: 9, kind: output, shape index: {}]  }
   0x1   :  { %v14_v0 = vstv %s1696_s8 }
   0x2   :  { %15 = vst [vmem:[#allocation2] sm:$0x1] %v14_v0 }
   0x3 LB: > { %s1112_s12 = sadd.s32 4294967295, %s1378_s11   ;;  %p1116_p0 = scmp.ge.s32.totalorder %s1378_s11, 1  ;;  %s1378_s11 = sphi %s1433_s11, %s21_s11  }
   0x4   : > { %p290_p1 = scmp.lt.s32.totalorder %s1378_s11, 3 }
   0x6   : > { %p291_p2 = pnand %p1116_p0, %p290_p1 }
   0x7   : > { %s1117_s8 = sshll.u32 (!%p291_p2), %s1112_s12, 4 }
   0x8   : > { %294 = sbr.rel (%p291_p2) target bundleno = 791 (0x317), region = 56  ;;  %p327_p3 = scmp.lt.s32.totalorder (!%p291_p2), %s1117_s8, 31 }
   0xd   : > { %v354_v1 = vld [vmem:[%s1689_s1] sm:$0xf]  ;;  %vm411_vm0 = vcmask 1043456   ;;  %v591_v2 = vld [vmem:[%s1691_s3 + $0x78] sm:$0xff]  ;;  %v590_v3 = vld [vmem:[%s1691_s3 + $0x70] sm:$0xff]  ;;  %s1699_s8 = smov (!%p327_p3, %s1117_s8), 31 }
   0xe   : > { %1226 = vmatprep.subr.msk.mxu0 %vm411_vm0, %v354_v1  ;;  %1252 = vmatprep.subr.mxu1 %v591_v2  ;;  %v589_v4 = vld [vmem:[%s1691_s3 + $0x68] sm:$0xff]  ;;  %v588_v5 = vld [vmem:[%s1691_s3 + $0x60] sm:$0xff]  ;;  %s1118_s23 = sshll.u32 %s1699_s8, 3  ;;  %vm362_vm1 = vcmask 31744   ;;  %v587_v6 = vld [vmem:[%s1691_s3 + $0x58] sm:$0xff]  ;;  %vm967_vm2 = vcmask 523264  }
   0xf   : > { %1227 = vmatpush3.msk.msra.mxu0 %vm411_vm0, %v354_v1  ;;  %1253 = vmatpush3.msra.mxu1 %v591_v2  ;;  %s1464_s26 = scalar_lea.vmem %s1688_s0, %s1118_s23  ;;  %v586_v10 = vld [vmem:[%s1691_s3 + $0x50] sm:$0xff]  ;;  %v585_v12 = vld [vmem:[%s1691_s3 + $0x48] sm:$0xff]  ;;  %v584_v14 = vld [vmem:[%s1691_s3 + $0x40] sm:$0xff]  ;;  %s1651_s16 = scalar_lea.vmem %s1697_s9, %s1118_s23  ;;  %vm1039_vm3 = vcmask 7168  }
  0x10   : > { %1254 = vmatprep.subr.mxu1 %v590_v3  ;;  %v338_v7 = vld [vmem:[%s1464_s26] sm:$0xff]  ;;  %v339_v8 = vld [vmem:[%s1464_s26 + $0x8] sm:$0xff]  ;;  %v340_v9 = vld [vmem:[%s1464_s26 + $0x10] sm:$0xff] }
  0x11   : > { %1255 = vmatpush3.msra.mxu1 %v590_v3  ;;  %1228 = vmatprep.mubr.msk.f32.mxu0 %vm362_vm1, %v338_v7  ;;  %v341_v11 = vld [vmem:[%s1464_s26 + $0x18] sm:$0xff]  ;;  %v342_v13 = vld [vmem:[%s1464_s26 + $0x20] sm:$0xff]  ;;  %v343_v15 = vld [vmem:[%s1464_s26 + $0x28] sm:$0xff] }
  0x12   : > { %1256 = vmatprep.subr.mxu1 %v589_v4  ;;  %1229 = vmatmul.mubr.msk.f32.vlgmr.msra.gmra.mxu0 %vm362_vm1, %v339_v8  ;;  %v583_v16 = vld [vmem:[%s1691_s3 + $0x38] sm:$0xff]  ;;  %v344_v17 = vld [vmem:[%s1464_s26 + $0x30] sm:$0xff]  ;;  %v581_v20 = vld [vmem:[%s1691_s3 + $0x28] sm:$0xff] }
  0x13   : > { %1257 = vmatpush3.msra.mxu1 %v589_v4  ;;  %1231 = vmatprep.mubr.msk.f32.mxu0 %vm362_vm1, %v340_v9  ;;  %v582_v18 = vld [vmem:[%s1691_s3 + $0x30] sm:$0xff]  ;;  %v345_v19 = vld [vmem:[%s1464_s26 + $0x38] sm:$0xff]  ;;  %v346_v21 = vld [vmem:[%s1464_s26 + $0x40] sm:$0xff] }
  0x14   : > { %1258 = vmatprep.subr.mxu1 %v588_v5  ;;  %v580_v22 = vld [vmem:[%s1691_s3 + $0x20] sm:$0xff]  ;;  %v347_v23 = vld [vmem:[%s1464_s26 + $0x48] sm:$0xff]  ;;  %v348_v24 = vld [vmem:[%s1464_s26 + $0x50] sm:$0xff] }
  0x15   : > { %1259 = vmatpush3.msra.mxu1 %v588_v5  ;;  %v349_v25 = vld [vmem:[%s1464_s26 + $0x58] sm:$0xff]  ;;  %v350_v26 = vld [vmem:[%s1464_s26 + $0x60] sm:$0xff]  ;;  %v351_v27 = vld [vmem:[%s1464_s26 + $0x68] sm:$0xff] }
  0x16   : > { %1260 = vmatprep.subr.mxu1 %v587_v6  ;;  %1232 = vmatmul.mubr.msk.f32.gmra.mxu0 %vm362_vm1, %v341_v11  ;;  %v352_v28 = vld [vmem:[%s1464_s26 + $0x70] sm:$0xff]  ;;  %v353_v29 = vld [vmem:[%s1464_s26 + $0x78] sm:$0xff]  ;;  %v577_v32 = vld [vmem:[%s1691_s3 + $0x8] sm:$0xff] }
  0x17   : > { %1261 = vmatpush3.msra.mxu1 %v587_v6  ;;  %1234 = vmatprep.mubr.msk.f32.mxu0 %vm362_vm1, %v342_v13  ;;  %v579_v30 = vld [vmem:[%s1691_s3 + $0x18] sm:$0xff]  ;;  %v578_v31 = vld [vmem:[%s1691_s3 + $0x10] sm:$0xff]  ;;  %v576_v33 = vld [vmem:[%s1691_s3] sm:$0xff] }
  0x18   : > { %1262 = vmatprep.subr.mxu1 %v586_v10  ;;  %v775_v34 = vld [vmem:[%s1693_s5 + $0x78] sm:$0xff]  ;;  %v774_v35 = vld [vmem:[%s1693_s5 + $0x70] sm:$0xff]  ;;  %v773_v36 = vld [vmem:[%s1693_s5 + $0x68] sm:$0xff] }
  0x19   : > { %1263 = vmatpush3.msra.mxu1 %v586_v10  ;;  %1308 = vmatprep.subr.mxu0 %v775_v34  ;;  %v772_v37 = vld [vmem:[%s1693_s5 + $0x60] sm:$0xff]  ;;  %v771_v38 = vld [vmem:[%s1693_s5 + $0x58] sm:$0xff]  ;;  %v770_v39 = vld [vmem:[%s1693_s5 + $0x50] sm:$0xff] }
  0x1a   : > { %1264 = vmatprep.subr.mxu1 %v585_v12  ;;  %1235 = vmatmul.mubr.msk.f32.gmra.mxu0 %vm362_vm1, %v343_v15  ;;  %v769_v40 = vld [vmem:[%s1693_s5 + $0x48] sm:$0xff]  ;;  %v768_v41 = vld [vmem:[%s1693_s5 + $0x40] sm:$0xff]  ;;  %v767_v42 = vld [vmem:[%s1693_s5 + $0x38] sm:$0xff] }
  0x1b   : > { %1265 = vmatpush3.msra.mxu1 %v585_v12  ;;  %1237 = vmatprep.mubr.msk.f32.mxu0 %vm362_vm1, %v344_v17  ;;  %v766_v43 = vld [vmem:[%s1693_s5 + $0x30] sm:$0xff]  ;;  %v765_v44 = vld [vmem:[%s1693_s5 + $0x28] sm:$0xff]  ;;  %v764_v45 = vld [vmem:[%s1693_s5 + $0x20] sm:$0xff] }
  0x1c   : > { %1266 = vmatprep.subr.mxu1 %v584_v14  ;;  %1309 = vmatpush3.msra.mxu0 %v775_v34  ;;  %v763_v46 = vld [vmem:[%s1693_s5 + $0x18] sm:$0xff]  ;;  %v1121_v47 = vld [vmem:[%s1690_s2] ss:$0 sm:$0xff] }
  0x1d   : > { %1267 = vmatpush3.msra.mxu1 %v584_v14  ;;  %1310 = vmatprep.subr.mxu0 %v774_v35  ;;  %v760_v34 = vld [vmem:[%s1693_s5] sm:$0xff] }
  0x1e   : > { %1268 = vmatprep.subr.mxu1 %v583_v16  ;;  %1238 = vmatmul.mubr.msk.f32.gmra.mxu0 %vm362_vm1, %v345_v19 }
  0x1f   : > { %1269 = vmatpush3.msra.mxu1 %v583_v16  ;;  %1240 = vmatprep.mubr.msk.f32.mxu0 %vm362_vm1, %v346_v21 }
  0x20   : > { %1270 = vmatprep.subr.mxu1 %v582_v18  ;;  %1311 = vmatpush3.msra.mxu0 %v774_v35  ;;  %v1139_v35 = vld [vmem:[%s1692_s4] ss:$0 sm:$0xff] }
  0x21   : > { %1271 = vmatpush3.msra.mxu1 %v582_v18  ;;  %1312 = vmatprep.subr.mxu0 %v773_v36 }
  0x22   : > { %1272 = vmatprep.subr.mxu1 %v581_v20  ;;  %1241 = vmatmul.mubr.msk.f32.gmra.mxu0 %vm362_vm1, %v347_v23 }
  0x23   : > { %1273 = vmatpush3.msra.mxu1 %v581_v20  ;;  %1243 = vmatprep.mubr.msk.f32.mxu0 %vm362_vm1, %v348_v24 }
  0x24   : > { %1274 = vmatprep.subr.mxu1 %v580_v22  ;;  %1313 = vmatpush3.msra.mxu0 %v773_v36 }
  0x25   : > { %1275 = vmatpush3.msra.mxu1 %v580_v22  ;;  %1314 = vmatprep.subr.mxu0 %v772_v37 }
  0x26   : > { %1244 = vmatmul.mubr.msk.f32.gmra.mxu0 %vm362_vm1, %v349_v25  ;;  %1276 = vmatprep.subr.mxu1 %v579_v30 }
  0x27   : > { %1246 = vmatprep.mubr.msk.f32.mxu0 %vm362_vm1, %v350_v26  ;;  %1277 = vmatpush3.msra.mxu1 %v579_v30 }
  0x28   : > { %1278 = vmatprep.subr.mxu1 %v578_v31  ;;  %1315 = vmatpush3.msra.mxu0 %v772_v37 }
  0x29   : > { %1279 = vmatpush3.msra.mxu1 %v578_v31  ;;  %1316 = vmatprep.subr.mxu0 %v771_v38 }
  0x2a   : > { %1247 = vmatmul.mubr.msk.f32.gmra.mxu0 %vm362_vm1, %v351_v27  ;;  %1280 = vmatprep.subr.mxu1 %v577_v32 }
  0x2b   : > { %1249 = vmatprep.mubr.msk.f32.mxu0 %vm362_vm1, %v352_v28  ;;  %1281 = vmatpush3.msra.mxu1 %v577_v32  ;;  %v762_v32 = vld [vmem:[%s1693_s5 + $0x10] sm:$0xff] }
  0x2c   : > { %1282 = vmatprep.subr.mxu1 %v576_v33  ;;  %1317 = vmatpush3.msra.mxu0 %v771_v38 }
  0x2d   : > { %1283 = vmatpush3.msra.mxu1 %v576_v33  ;;  %1318 = vmatprep.subr.mxu0 %v770_v39  ;;  %v761_v33 = vld [vmem:[%s1693_s5 + $0x8] sm:$0xff] }
  0x2e   : > { %1250 = vmatmul.mubr.msk.f32.gmra.mxu0 %vm362_vm1, %v353_v29 }
  0x2f   : > { %1319 = vmatpush3.msra.mxu0 %v770_v39 }
  0x30   : > { %1320 = vmatprep.subr.mxu0 %v769_v40 }
  0x31   : > { %1321 = vmatpush3.msra.mxu0 %v769_v40 }
  0x32   : > { %1322 = vmatprep.subr.mxu0 %v768_v41 }
  0x33   : > { %1323 = vmatpush3.msra.mxu0 %v768_v41 }
  0x34   : > { %1324 = vmatprep.subr.mxu0 %v767_v42 }
  0x35   : > { %1325 = vmatpush3.msra.mxu0 %v767_v42 }
  0x36   : > { %1326 = vmatprep.subr.mxu0 %v766_v43 }
  0x37   : > { %1327 = vmatpush3.msra.mxu0 %v766_v43 }
  0x38   : > { %1328 = vmatprep.subr.mxu0 %v765_v44 }
  0x39   : > { %1329 = vmatpush3.msra.mxu0 %v765_v44 }
  0x3a   : > { %1330 = vmatprep.subr.mxu0 %v764_v45 }
  0x3b   : > { %1331 = vmatpush3.msra.mxu0 %v764_v45 }
  0x3c   : > { %1332 = vmatprep.subr.mxu0 %v763_v46 }
  0x3d   : > { %1333 = vmatpush3.msra.mxu0 %v763_v46 }
  0x3e   : > { %1334 = vmatprep.subr.mxu0 %v762_v32 }
  0x3f   : > { %1335 = vmatpush3.msra.mxu0 %v762_v32 }
  0x40   : > { %1336 = vmatprep.subr.mxu0 %v761_v33 }
  0x41   : > { %1337 = vmatpush3.msra.mxu0 %v761_v33 }
  0x42   : > { %1338 = vmatprep.subr.mxu0 %v760_v34 }
  0x43   : > { %1339 = vmatpush3.msra.mxu0 %v760_v34 }
  0xd2   : > { %v1230_v48 = vpop.f32.mrf.mxu0 }
  0xd3   : > { %v487_v49 = vadd.f32 %v1230_v48, %v1121_v47 }
  0xd4   : > { %v481_v50 = vpop.f32.mrf.mxu0 }
  0xd5   : > { %v482_v51 = vadd.f32 %v1121_v47, %v481_v50  ;;  %v561_v54 = vmax.f32 %v487_v49, 0.0 }
  0xd6   : > { %v1233_v52 = vpop.f32.mrf.mxu0 }
  0xd7   : > { %v560_v53 = vmax.f32 %v482_v51, 0.0  ;;  %v497_v55 = vadd.f32 %v1233_v52, %v1121_v47 }
  0xd8   : > { %v491_v56 = vpop.f32.mrf.mxu0 }
  0xd9   : > { %v492_v57 = vadd.f32 %v1121_v47, %v491_v56  ;;  %1284 = vmatprep.mubr.f32.mxu1 %v560_v53  ;;  %v563_v61 = vmax.f32 %v497_v55, 0.0 }
  0xda   : > { %v1236_v58 = vpop.f32.mrf.mxu0  ;;  %1285 = vmatmul.mubr.f32.vlgmr.msra.gmra.mxu1 %v561_v54 }
  0xdb   : > { %v562_v59 = vmax.f32 %v492_v57, 0.0  ;;  %v507_v60 = vadd.f32 %v1236_v58, %v1121_v47 }
  0xdc   : > { %v501_v62 = vpop.f32.mrf.mxu0 }
  0xdd   : > { %v502_v63 = vadd.f32 %v1121_v47, %v501_v62  ;;  %1287 = vmatprep.mubr.f32.mxu1 %v562_v59  ;;  %v565_v0 = vmax.f32 %v507_v60, 0.0 }
  0xde   : > { %v1239_v1 = vpop.f32.mrf.mxu0  ;;  %1288 = vmatmul.mubr.f32.gmra.mxu1 %v563_v61 }
  0xdf   : > { %v564_v2 = vmax.f32 %v502_v63, 0.0  ;;  %v517_v3 = vadd.f32 %v1239_v1, %v1121_v47 }
  0xe0   : > { %v511_v4 = vpop.f32.mrf.mxu0 }
  0xe1   : > { %v512_v5 = vadd.f32 %v1121_v47, %v511_v4  ;;  %1290 = vmatprep.mubr.f32.mxu1 %v564_v2  ;;  %v567_v6 = vmax.f32 %v517_v3, 0.0 }
  0xe2   : > { %v1242_v7 = vpop.f32.mrf.mxu0  ;;  %1291 = vmatmul.mubr.f32.gmra.mxu1 %v565_v0 }
  0xe3   : > { %v566_v8 = vmax.f32 %v512_v5, 0.0  ;;  %v527_v9 = vadd.f32 %v1242_v7, %v1121_v47 }
  0xe4   : > { %v521_v10 = vpop.f32.mrf.mxu0 }
  0xe5   : > { %v522_v11 = vadd.f32 %v1121_v47, %v521_v10  ;;  %1293 = vmatprep.mubr.f32.mxu1 %v566_v8  ;;  %v569_v12 = vmax.f32 %v527_v9, 0.0 }
  0xe6   : > { %v1245_v13 = vpop.f32.mrf.mxu0  ;;  %1294 = vmatmul.mubr.f32.gmra.mxu1 %v567_v6 }
  0xe7   : > { %v568_v14 = vmax.f32 %v522_v11, 0.0  ;;  %v537_v15 = vadd.f32 %v1245_v13, %v1121_v47 }
  0xe8   : > { %v531_v16 = vpop.f32.mrf.mxu0 }
  0xe9   : > { %v532_v17 = vadd.f32 %v1121_v47, %v531_v16  ;;  %1296 = vmatprep.mubr.f32.mxu1 %v568_v14  ;;  %v571_v18 = vmax.f32 %v537_v15, 0.0 }
  0xea   : > { %v1248_v19 = vpop.f32.mrf.mxu0  ;;  %1297 = vmatmul.mubr.f32.gmra.mxu1 %v569_v12 }
  0xeb   : > { %v570_v20 = vmax.f32 %v532_v17, 0.0  ;;  %v547_v21 = vadd.f32 %v1248_v19, %v1121_v47 }
  0xec   : > { %v541_v22 = vpop.f32.mrf.mxu0 }
  0xed   : > { %v542_v23 = vadd.f32 %v1121_v47, %v541_v22  ;;  %1299 = vmatprep.mubr.f32.mxu1 %v570_v20  ;;  %v573_v24 = vmax.f32 %v547_v21, 0.0  ;;  %v1591_v20 = vld [vmem:[%s1694_s6] ss:$0 sm:$0xff] }
  0xee   : > { %v1251_v25 = vpop.f32.mrf.mxu0  ;;  %1300 = vmatmul.mubr.f32.gmra.mxu1 %v571_v18 }
  0xef   : > { %v572_v26 = vmax.f32 %v542_v23, 0.0  ;;  %v557_v27 = vadd.f32 %v1251_v25, %v1121_v47 }
  0xf0   : > { %v551_v28 = vpop.f32.mrf.mxu0 }
  0xf1   : > { %v552_v29 = vadd.f32 %v1121_v47, %v551_v28  ;;  %1302 = vmatprep.mubr.f32.mxu1 %v572_v26  ;;  %v575_v30 = vmax.f32 %v557_v27, 0.0 }
  0xf2   : > { %1303 = vmatmul.mubr.f32.gmra.mxu1 %v573_v24  ;;  %v1597_v24 = vld [vmem:[%s1695_s7] ss:$0 sm:$0xff] }
  0xf3   : > { %v574_v31 = vmax.f32 %v552_v29, 0.0 }
  0xf5   : > { %1305 = vmatprep.mubr.f32.mxu1 %v574_v31 }
  0xf6   : > { %1306 = vmatmul.mubr.f32.gmra.mxu1 %v575_v30 }
 0x19a   : > { %v1286_v36 = vpop.f32.mrf.mxu1 }
 0x19b   : > { %v671_v37 = vadd.f32 %v1286_v36, %v1139_v35 }
 0x19c   : > { %v665_v38 = vpop.f32.mrf.mxu1 }
 0x19d   : > { %v666_v39 = vadd.f32 %v1139_v35, %v665_v38  ;;  %v745_v42 = vmax.f32 %v671_v37, 0.0 }
 0x19e   : > { %v1289_v40 = vpop.f32.mrf.mxu1 }
 0x19f   : > { %v744_v41 = vmax.f32 %v666_v39, 0.0  ;;  %v681_v43 = vadd.f32 %v1289_v40, %v1139_v35 }
 0x1a0   : > { %v675_v44 = vpop.f32.mrf.mxu1 }
 0x1a1   : > { %v676_v45 = vadd.f32 %v1139_v35, %v675_v44  ;;  %1340 = vmatprep.mubr.f32.mxu0 %v744_v41  ;;  %v747_v48 = vmax.f32 %v681_v43, 0.0 }
 0x1a2   : > { %v1292_v46 = vpop.f32.mrf.mxu1  ;;  %1341 = vmatmul.mubr.f32.vlgmr.msra.gmra.mxu0 %v745_v42 }
 0x1a3   : > { %v746_v47 = vmax.f32 %v676_v45, 0.0  ;;  %v691_v49 = vadd.f32 %v1292_v46, %v1139_v35 }
 0x1a4   : > { %v685_v50 = vpop.f32.mrf.mxu1 }
 0x1a5   : > { %v686_v51 = vadd.f32 %v1139_v35, %v685_v50  ;;  %1343 = vmatprep.mubr.f32.mxu0 %v746_v47  ;;  %v749_v54 = vmax.f32 %v691_v49, 0.0 }
 0x1a6   : > { %v1295_v52 = vpop.f32.mrf.mxu1  ;;  %1344 = vmatmul.mubr.f32.gmra.mxu0 %v747_v48 }
 0x1a7   : > { %v748_v53 = vmax.f32 %v686_v51, 0.0  ;;  %v701_v55 = vadd.f32 %v1295_v52, %v1139_v35 }
 0x1a8   : > { %v695_v56 = vpop.f32.mrf.mxu1 }
 0x1a9   : > { %v696_v57 = vadd.f32 %v1139_v35, %v695_v56  ;;  %1346 = vmatprep.mubr.f32.mxu0 %v748_v53  ;;  %v751_v60 = vmax.f32 %v701_v55, 0.0 }
 0x1aa   : > { %v1298_v58 = vpop.f32.mrf.mxu1  ;;  %1347 = vmatmul.mubr.f32.gmra.mxu0 %v749_v54 }
 0x1ab   : > { %v750_v59 = vmax.f32 %v696_v57, 0.0  ;;  %v711_v61 = vadd.f32 %v1298_v58, %v1139_v35 }
 0x1ac   : > { %v705_v62 = vpop.f32.mrf.mxu1 }
 0x1ad   : > { %v706_v63 = vadd.f32 %v1139_v35, %v705_v62  ;;  %1349 = vmatprep.mubr.f32.mxu0 %v750_v59  ;;  %v753_v2 = vmax.f32 %v711_v61, 0.0 }
 0x1ae   : > { %v1301_v0 = vpop.f32.mrf.mxu1  ;;  %1350 = vmatmul.mubr.f32.gmra.mxu0 %v751_v60 }
 0x1af   : > { %v752_v1 = vmax.f32 %v706_v63, 0.0  ;;  %v721_v3 = vadd.f32 %v1301_v0, %v1139_v35 }
 0x1b0   : > { %v715_v4 = vpop.f32.mrf.mxu1 }
 0x1b1   : > { %v716_v5 = vadd.f32 %v1139_v35, %v715_v4  ;;  %1352 = vmatprep.mubr.f32.mxu0 %v752_v1  ;;  %v755_v8 = vmax.f32 %v721_v3, 0.0 }
 0x1b2   : > { %v1304_v6 = vpop.f32.mrf.mxu1  ;;  %1353 = vmatmul.mubr.f32.gmra.mxu0 %v753_v2 }
 0x1b3   : > { %v754_v7 = vmax.f32 %v716_v5, 0.0  ;;  %v731_v9 = vadd.f32 %v1304_v6, %v1139_v35 }
 0x1b4   : > { %v725_v10 = vpop.f32.mrf.mxu1 }
 0x1b5   : > { %v726_v11 = vadd.f32 %v1139_v35, %v725_v10  ;;  %1355 = vmatprep.mubr.f32.mxu0 %v754_v7  ;;  %v757_v14 = vmax.f32 %v731_v9, 0.0 }
 0x1b6   : > { %v1307_v12 = vpop.f32.mrf.mxu1  ;;  %1356 = vmatmul.mubr.f32.gmra.mxu0 %v755_v8 }
 0x1b7   : > { %v756_v13 = vmax.f32 %v726_v11, 0.0  ;;  %v741_v15 = vadd.f32 %v1307_v12, %v1139_v35 }
 0x1b8   : > { %v735_v16 = vpop.f32.mrf.mxu1 }
 0x1b9   : > { %v736_v17 = vadd.f32 %v1139_v35, %v735_v16  ;;  %1358 = vmatprep.mubr.f32.mxu0 %v756_v13  ;;  %v759_v19 = vmax.f32 %v741_v15, 0.0 }
 0x1ba   : > { %1359 = vmatmul.mubr.f32.gmra.mxu0 %v757_v14 }
 0x1bb   : > { %v758_v18 = vmax.f32 %v736_v17, 0.0 }
 0x1bd   : > { %1361 = vmatprep.mubr.f32.mxu0 %v758_v18 }
 0x1be   : > { %1362 = vmatmul.mubr.f32.gmra.mxu0 %v759_v19 }
 0x262   : > { %v1342_v21 = vpop.f32.mrf.mxu0 }
 0x263   : > { %v855_v22 = vadd.f32 %v1342_v21, %v1591_v20 }
 0x264   : > { %v849_v23 = vpop.f32.mrf.mxu0 }
 0x265   : > { %v929_v25 = vmax.f32 %v855_v22, 0.0  ;;  %v850_v26 = vadd.f32 %v1591_v20, %v849_v23 }
 0x266   : > { %v1345_v27 = vpop.f32.mrf.mxu0 }
 0x267   : > { %v928_v28 = vmax.f32 %v850_v26, 0.0  ;;  %v865_v29 = vadd.f32 %v1345_v27, %v1591_v20  ;;  %v952_v30 = vmul.f32 %v1597_v24, %v929_v25 }
 0x268   : > { %v859_v31 = vpop.f32.mrf.mxu0 }
 0x269   : > { %v931_v32 = vmax.f32 %v865_v29, 0.0  ;;  %v860_v33 = vadd.f32 %v1591_v20, %v859_v31  ;;  %v971_v34 = vsel %vm967_vm2, %v952_v30, 0.0  ;;  %v951_v35 = vmul.f32 %v1597_v24, %v928_v28 }
 0x26a   : > { %972 = vadd.xlane.f32.xlu0 %v971_v34  ;;  %v1348_v36 = vpop.f32.mrf.mxu0 }
 0x26b   : > { %v930_v37 = vmax.f32 %v860_v33, 0.0  ;;  %v875_v38 = vadd.f32 %v1348_v36, %v1591_v20  ;;  %v954_v39 = vmul.f32 %v1597_v24, %v931_v32  ;;  %v968_v41 = vsel %vm967_vm2, %v951_v35, 0.0 }
 0x26c   : > { %v869_v40 = vpop.f32.mrf.mxu0 }
 0x26d   : > { %v933_v42 = vmax.f32 %v875_v38, 0.0  ;;  %v870_v43 = vadd.f32 %v1591_v20, %v869_v40  ;;  %v977_v44 = vsel %vm967_vm2, %v954_v39, 0.0  ;;  %v953_v45 = vmul.f32 %v1597_v24, %v930_v37  ;;  %v1142_v39 = vld [vmem:[#allocation2] ss:$0 sm:$0xff] }
 0x26e   : > { %978 = vadd.xlane.f32.xlu1 %v977_v44  ;;  %v1351_v46 = vpop.f32.mrf.mxu0  ;;  %969 = vadd.xlane.f32.xlu0 %v968_v41 }
 0x26f   : > { %v932_v47 = vmax.f32 %v870_v43, 0.0  ;;  %v885_v48 = vadd.f32 %v1351_v46, %v1591_v20  ;;  %v974_v50 = vsel %vm967_vm2, %v953_v45, 0.0  ;;  %v956_v54 = vmul.f32 %v1597_v24, %v933_v42 }
 0x270   : > { %v879_v49 = vpop.f32.mrf.mxu0 }
 0x271   : > { %v935_v51 = vmax.f32 %v885_v48, 0.0  ;;  %v880_v52 = vadd.f32 %v1591_v20, %v879_v49  ;;  %v955_v53 = vmul.f32 %v1597_v24, %v932_v47  ;;  %v983_v63 = vsel %vm967_vm2, %v956_v54, 0.0 }
 0x272   : > { %v1354_v55 = vpop.f32.mrf.mxu0  ;;  %975 = vadd.xlane.f32.xlu1 %v974_v50 }
 0x273   : > { %v934_v56 = vmax.f32 %v880_v52, 0.0  ;;  %v895_v57 = vadd.f32 %v1354_v55, %v1591_v20  ;;  %v980_v58 = vsel %vm967_vm2, %v955_v53, 0.0  ;;  %v958_v60 = vmul.f32 %v1597_v24, %v935_v51 }
 0x274   : > { %v889_v59 = vpop.f32.mrf.mxu0  ;;  %981 = vadd.xlane.f32.xlu0 %v980_v58 }
 0x275   : > { %v937_v61 = vmax.f32 %v895_v57, 0.0  ;;  %v890_v62 = vadd.f32 %v1591_v20, %v889_v59  ;;  %v957_v0 = vmul.f32 %v1597_v24, %v934_v56  ;;  %v989_v6 = vsel %vm967_vm2, %v958_v60, 0.0 }
 0x276   : > { %v1357_v1 = vpop.f32.mrf.mxu0  ;;  %984 = vadd.xlane.f32.xlu1 %v983_v63 }
 0x277   : > { %v936_v2 = vmax.f32 %v890_v62, 0.0  ;;  %v905_v3 = vadd.f32 %v1357_v1, %v1591_v20  ;;  %v986_v4 = vsel %vm967_vm2, %v957_v0, 0.0  ;;  %v960_v10 = vmul.f32 %v1597_v24, %v937_v61 }
 0x278   : > { %v899_v5 = vpop.f32.mrf.mxu0  ;;  %987 = vadd.xlane.f32.xlu0 %v986_v4 }
 0x279   : > { %v939_v7 = vmax.f32 %v905_v3, 0.0  ;;  %v900_v8 = vadd.f32 %v1591_v20, %v899_v5  ;;  %v959_v9 = vmul.f32 %v1597_v24, %v936_v2  ;;  %v995_v19 = vsel %vm967_vm2, %v960_v10, 0.0 }
 0x27a   : > { %v1360_v11 = vpop.f32.mrf.mxu0  ;;  %990 = vadd.xlane.f32.xlu1 %v989_v6 }
 0x27b   : > { %v938_v12 = vmax.f32 %v900_v8, 0.0  ;;  %v915_v13 = vadd.f32 %v1360_v11, %v1591_v20  ;;  %v992_v14 = vsel %vm967_vm2, %v959_v9, 0.0  ;;  %v962_v16 = vmul.f32 %v1597_v24, %v939_v7 }
 0x27c   : > { %v909_v15 = vpop.f32.mrf.mxu0  ;;  %993 = vadd.xlane.f32.xlu0 %v992_v14 }
 0x27d   : > { %v941_v17 = vmax.f32 %v915_v13, 0.0  ;;  %v910_v18 = vadd.f32 %v1591_v20, %v909_v15  ;;  %v961_v21 = vmul.f32 %v1597_v24, %v938_v12  ;;  %v1001_v28 = vsel %vm967_vm2, %v962_v16, 0.0 }
 0x27e   : > { %v1363_v22 = vpop.f32.mrf.mxu0  ;;  %996 = vadd.xlane.f32.xlu1 %v995_v19 }
 0x27f   : > { %v940_v23 = vmax.f32 %v910_v18, 0.0  ;;  %v925_v25 = vadd.f32 %v1363_v22, %v1591_v20  ;;  %v998_v26 = vsel %vm967_vm2, %v961_v21, 0.0  ;;  %v964_v32 = vmul.f32 %v1597_v24, %v941_v17 }
 0x280   : > { %v919_v27 = vpop.f32.mrf.mxu0  ;;  %999 = vadd.xlane.f32.xlu0 %v998_v26 }
 0x281   : > { %v943_v29 = vmax.f32 %v925_v25, 0.0  ;;  %v920_v30 = vadd.f32 %v1591_v20, %v919_v27  ;;  %v963_v31 = vmul.f32 %v1597_v24, %v940_v23  ;;  %v1007_v35 = vsel %vm967_vm2, %v964_v32, 0.0 }
 0x282   : > { %1002 = vadd.xlane.f32.xlu1 %v1001_v28 }
 0x283   : > { %v942_v33 = vmax.f32 %v920_v30, 0.0  ;;  %v1004_v34 = vsel %vm967_vm2, %v963_v31, 0.0  ;;  %v966_v37 = vmul.f32 %v1597_v24, %v943_v29 }
 0x284   : > { %1005 = vadd.xlane.f32.xlu0 %v1004_v34 }
 0x285   : > { %v965_v36 = vmul.f32 %v1597_v24, %v942_v33  ;;  %v1013_v20 = vsel %vm967_vm2, %v966_v37, 0.0 }
 0x286   : > { %1008 = vadd.xlane.f32.xlu1 %v1007_v35 }
 0x287   : > { %v1010_v38 = vsel %vm967_vm2, %v965_v36, 0.0 }
 0x288   : > { %1011 = vadd.xlane.f32.xlu0 %v1010_v38 }
 0x28a   : > { %1014 = vadd.xlane.f32.xlu1 %v1013_v20 }
 0x2f3   : > { %v973_v24 = vpop.xlane.xlu0 %972 }
 0x2f4   : > { %v1024_v40 = vadd.f32 %v1142_v39, %v973_v24 }
 0x2f6   : > { %1041 = vst.msk [vmem:[%s1651_s16 + $0x8] sm:$0xff] %vm1039_vm3, %v1024_v40 }
 0x2f7   : > { %v979_v41 = vpop.xlane.xlu1 %978  ;;  %v970_v42 = vpop.xlane.xlu0 %969 }
 0x2f8   : > { %v1026_v43 = vadd.f32 %v1142_v39, %v979_v41  ;;  %v1023_v44 = vadd.f32 %v1142_v39, %v970_v42 }
 0x2fa   : > { %1043 = vst.msk [vmem:[%s1651_s16 + $0x18] sm:$0xff] %vm1039_vm3, %v1026_v43  ;;  %1040 = vst.msk [vmem:[%s1651_s16] sm:$0xff] %vm1039_vm3, %v1023_v44 }
 0x2fb   : > { %v976_v45 = vpop.xlane.xlu1 %975 }
 0x2fc   : > { %v1025_v46 = vadd.f32 %v1142_v39, %v976_v45 }
 0x2fd   : > { %v982_v47 = vpop.xlane.xlu0 %981 }
 0x2fe   : > { %1042 = vst.msk [vmem:[%s1651_s16 + $0x10] sm:$0xff] %vm1039_vm3, %v1025_v46  ;;  %v1027_v48 = vadd.f32 %v1142_v39, %v982_v47 }
 0x2ff   : > { %v985_v49 = vpop.xlane.xlu1 %984 }
 0x300   : > { %1044 = vst.msk [vmem:[%s1651_s16 + $0x20] sm:$0xff] %vm1039_vm3, %v1027_v48  ;;  %v1028_v50 = vadd.f32 %v1142_v39, %v985_v49 }
 0x301   : > { %v988_v51 = vpop.xlane.xlu0 %987 }
 0x302   : > { %1045 = vst.msk [vmem:[%s1651_s16 + $0x28] sm:$0xff] %vm1039_vm3, %v1028_v50  ;;  %v1029_v52 = vadd.f32 %v1142_v39, %v988_v51 }
 0x303   : > { %v991_v53 = vpop.xlane.xlu1 %990 }
 0x304   : > { %1046 = vst.msk [vmem:[%s1651_s16 + $0x30] sm:$0xff] %vm1039_vm3, %v1029_v52  ;;  %v1030_v54 = vadd.f32 %v1142_v39, %v991_v53 }
 0x305   : > { %v994_v55 = vpop.xlane.xlu0 %993 }
 0x306   : > { %1047 = vst.msk [vmem:[%s1651_s16 + $0x38] sm:$0xff] %vm1039_vm3, %v1030_v54  ;;  %v1031_v56 = vadd.f32 %v1142_v39, %v994_v55 }
 0x307   : > { %v997_v57 = vpop.xlane.xlu1 %996 }
 0x308   : > { %1048 = vst.msk [vmem:[%s1651_s16 + $0x40] sm:$0xff] %vm1039_vm3, %v1031_v56  ;;  %v1032_v58 = vadd.f32 %v1142_v39, %v997_v57 }
 0x309   : > { %v1000_v59 = vpop.xlane.xlu0 %999 }
 0x30a   : > { %1049 = vst.msk [vmem:[%s1651_s16 + $0x48] sm:$0xff] %vm1039_vm3, %v1032_v58  ;;  %v1033_v60 = vadd.f32 %v1142_v39, %v1000_v59 }
 0x30b   : > { %v1003_v61 = vpop.xlane.xlu1 %1002 }
 0x30c   : > { %1050 = vst.msk [vmem:[%s1651_s16 + $0x50] sm:$0xff] %vm1039_vm3, %v1033_v60  ;;  %v1034_v62 = vadd.f32 %v1142_v39, %v1003_v61 }
 0x30d   : > { %v1006_v63 = vpop.xlane.xlu0 %1005 }
 0x30e   : > { %1051 = vst.msk [vmem:[%s1651_s16 + $0x58] sm:$0xff] %vm1039_vm3, %v1034_v62  ;;  %v1035_v0 = vadd.f32 %v1142_v39, %v1006_v63 }
 0x30f   : > { %v1009_v1 = vpop.xlane.xlu1 %1008 }
 0x310   : > { %1052 = vst.msk [vmem:[%s1651_s16 + $0x60] sm:$0xff] %vm1039_vm3, %v1035_v0  ;;  %v1036_v2 = vadd.f32 %v1142_v39, %v1009_v1 }
 0x311   : > { %v1012_v3 = vpop.xlane.xlu0 %1011 }
 0x312   : > { %1053 = vst.msk [vmem:[%s1651_s16 + $0x68] sm:$0xff] %vm1039_vm3, %v1036_v2  ;;  %v1037_v4 = vadd.f32 %v1142_v39, %v1012_v3 }
 0x313   : > { %v1015_v5 = vpop.xlane.xlu1 %1014 }
 0x314   : > { %1054 = vst.msk [vmem:[%s1651_s16 + $0x70] sm:$0xff] %vm1039_vm3, %v1037_v4  ;;  %v1038_v6 = vadd.f32 %v1142_v39, %v1015_v5 }
 0x316   : > { %1055 = vst.msk [vmem:[%s1651_s16 + $0x78] sm:$0xff] %vm1039_vm3, %v1038_v6 }
 0x317 PF: > { %s21_s11 = sadd.s32 1, %s1378_s11  }
 0x318   : > { %p18_p4 = scmp.ge.s32.totalorder %s21_s11, 4  }
 0x31a   :  { %20 = sbr.rel (!%p18_p4) target bundleno = 3 (0x3), region = 86 }

</bundles_post_ra>
